<compile_context>
chip_gen: v5e
topology: v5e:2x2
jax: 0.10.0
libtpu: 0.0.40
codegen_flags: <defaults>
</compile_context>

<pallas_src>
import functools

import jax
import jax.numpy as jnp
from jax.experimental import pallas as pl
from jax.experimental.pallas import tpu as pltpu


def _round_up(x, m):
    return (x + m - 1) // m * m


def _double_conv_kernel(x_ref, m_ref, w1_ref, b1_ref, w2_ref, b2_ref, o_ref,
                        *, M, Lin, Lout):
    # x_ref : (M, Lin)      M = B*Hp rows = B whole padded/row-aligned images,
    #                       lanes packed as (W, Cin).
    # m_ref : (M, 1)        1.0 at valid image rows, 0.0 at pad/alignment rows.
    # w1_ref: (3*Lin, Lout) banded weights, the 3 dy taps stacked along K.
    # b1_ref: (1, Lout)     bias tiled across W.
    # w2_ref: (3*Lout, Lout)
    # b2_ref: (1, Lout)
    # o_ref : (M, Lout)     lane-dense output rows (pad rows hold don't-care data).
    f32 = jnp.float32
    xp = x_ref[...]

    # ---- stage 1: conv3x3 (+W pad folded into banded weights) as ONE matmul ----
    zx = jnp.zeros((1, Lin), f32)
    x_up = jnp.concatenate([zx, xp[:M - 1, :]], axis=0)     # row r-1  (dy=0 tap)
    x_dn = jnp.concatenate([xp[1:, :], zx], axis=0)         # row r+1  (dy=2 tap)
    x_slab = jnp.concatenate([x_up, xp, x_dn], axis=1)      # (M, 3*Lin)
    a1 = jnp.dot(x_slab, w1_ref[...], preferred_element_type=f32)
    # bias + ReLU, then zero the pad/alignment rows (they are the zero padding
    # that stage 2's conv must see).
    a1 = jnp.maximum(a1 + b1_ref[...], 0.0) * m_ref[...]

    # ---- stage 2: same structure, lane-dense store to HBM ----
    zy = jnp.zeros((1, Lout), f32)
    y_up = jnp.concatenate([zy, a1[:M - 1, :]], axis=0)
    y_dn = jnp.concatenate([a1[1:, :], zy], axis=0)
    y_slab = jnp.concatenate([y_up, a1, y_dn], axis=1)      # (M, 3*Lout)
    a2 = jnp.dot(y_slab, w2_ref[...], preferred_element_type=f32)
    o_ref[...] = jnp.maximum(a2 + b2_ref[...], 0.0).astype(o_ref.dtype)


def _band_weights(w_hwio, W):
    """Fold the conv's W axis (dx taps + zero padding) into 2D weight slabs.

    w_hwio: (3, 3, Cin, Cout). Returns (3, W*Cin, W*Cout) where slab[dy] has
    B[i*Cin + ci, j*Cout + co] = w_hwio[dy, i - j + 1, ci, co] when 0 <= i-j+1 < 3,
    else 0 (so padding=1 along W is implicit in the band structure).
    """
    _, _, Cin, Cout = w_hwio.shape
    i = jnp.arange(W)[:, None]          # input pixel (row block)
    j = jnp.arange(W)[None, :]          # output pixel (col block)
    d = i - j + 1                       # dx tap index
    valid = (d >= 0) & (d <= 2)
    taps = w_hwio[:, jnp.clip(d, 0, 2)]                      # (3, W, W, Cin, Cout)
    taps = jnp.where(valid[None, :, :, None, None], taps, 0.0)
    return taps.transpose(0, 1, 3, 2, 4).reshape(3, W * Cin, W * Cout)


def _pick_images_per_block(N, Hp, target_rows=256):
    """B images per grid step: fill MXU M (~256 rows) but keep >=2 steps (v7x)."""
    cap = max(1, target_rows // Hp)
    if N >= 2:
        cap = max(1, min(cap, N // 2))
    best = 1
    for b in range(1, min(N, cap) + 1):
        if N % b == 0:                  # B must divide N (no partial blocks)
            best = b
    return best


@jax.jit
def double_conv(x_nchw, params):
    """Matches PyTorch DoubleConv.forward. x_nchw: (N, Cin, H, W)."""
    w1, b1, w2, b2 = params
    N, Cin, H, W = x_nchw.shape
    Cout = w1.shape[0]
    Lin, Lout = W * Cin, W * Cout

    Hp = _round_up(H + 2, 8)            # conv pad rows + sublane alignment
    B = _pick_images_per_block(N, Hp)
    M = B * Hp                          # matmul M per grid step
    G = N // B                          # grid steps

    # NCHW -> NHWC, pad H (1 top pad row, bottom pad + alignment rows), lane-pack
    # W with channels, and stack images along rows: (N*Hp, W*Cin).
    # (These relayouts are fused by XLA into one pass around the kernel; the
    #  NCHW interface is fixed by the PyTorch module.)
    x = jnp.transpose(x_nchw, (0, 2, 3, 1)).astype(jnp.float32)
    xs = jnp.pad(x, ((0, 0), (1, Hp - H - 1), (0, 0), (0, 0))).reshape(N * Hp, Lin)

    # Row-validity mask (identical for every block since a block is B whole images).
    row = jnp.arange(M) % Hp
    mask = ((row >= 1) & (row <= H)).astype(jnp.float32).reshape(M, 1)

    # Hoisted weight relayout: PyTorch OIHW -> HWIO -> banded slabs, dy stacked on K.
    w1f = _band_weights(jnp.transpose(w1, (2, 3, 1, 0)), W).reshape(3 * Lin, Lout)
    w2f = _band_weights(jnp.transpose(w2, (2, 3, 1, 0)), W).reshape(3 * Lout, Lout)
    b1t = jnp.tile(b1, W).reshape(1, Lout)
    b2t = jnp.tile(b2, W).reshape(1, Lout)

    kernel = functools.partial(_double_conv_kernel, M=M, Lin=Lin, Lout=Lout)
    out2d = pl.pallas_call(
        kernel,
        out_shape=jax.ShapeDtypeStruct((N * Hp, Lout), jnp.float32),
        grid_spec=pltpu.PrefetchScalarGridSpec(
            num_scalar_prefetch=0,
            grid=(G,),
            in_specs=[
                pl.BlockSpec((M, Lin), lambda g: (g, 0)),
                pl.BlockSpec((M, 1), lambda g: (0, 0)),
                pl.BlockSpec((3 * Lin, Lout), lambda g: (0, 0)),
                pl.BlockSpec((1, Lout), lambda g: (0, 0)),
                pl.BlockSpec((3 * Lout, Lout), lambda g: (0, 0)),
                pl.BlockSpec((1, Lout), lambda g: (0, 0)),
            ],
            out_specs=pl.BlockSpec((M, Lout), lambda g: (g, 0)),
        ),
        compiler_params=pltpu.CompilerParams(
            dimension_semantics=("parallel",)),
    )(xs, mask, w1f, b1t, w2f, b2t)

    # (N*Hp, W*Cout) -> (N, Hp, W, Cout) -> drop pad rows -> NCHW
    out = out2d.reshape(N, Hp, W, Cout)[:, 1:H + 1]
    return jnp.transpose(out, (0, 3, 1, 2))


def init_params(key, in_channels, out_channels):
    k1, k2, k3, k4 = jax.random.split(key, 4)
    # Deterministic synthetic init (Kaiming-ish scale); not a checkpoint load.
    s1 = 1.0 / jnp.sqrt(in_channels * 9.0)
    s2 = 1.0 / jnp.sqrt(out_channels * 9.0)
    w1 = jax.random.uniform(k1, (out_channels, in_channels, 3, 3),
                            jnp.float32, -s1, s1)
    b1 = jax.random.uniform(k2, (out_channels,), jnp.float32, -s1, s1)
    w2 = jax.random.uniform(k3, (out_channels, out_channels, 3, 3),
                            jnp.float32, -s2, s2)
    b2 = jax.random.uniform(k4, (out_channels,), jnp.float32, -s2, s2)
    return w1, b1, w2, b2


def _reference(x_nchw, params):
    w1, b1, w2, b2 = params

    def conv(x, w, b):
        y = jax.lax.conv_general_dilated(
            x, w, window_strides=(1, 1), padding=((1, 1), (1, 1)),
            dimension_numbers=("NCHW", "OIHW", "NCHW"))
        return jax.nn.relu(y + b[None, :, None, None])

    return conv(conv(x_nchw, w1, b1), w2, b2)


if __name__ == "__main__":
    key = jax.random.PRNGKey(0)
    kx, kp = jax.random.split(key)

    N, Cin, Cout, H, W = 2, 4, 8, 16, 16
    x = jax.random.normal(kx, (N, Cin, H, W), dtype=jnp.float32)
    params = init_params(kp, Cin, Cout)

    out = double_conv(x, params)
    out = jax.block_until_ready(out)

    ref = _reference(x, params)
    assert out.shape == (N, Cout, H, W), out.shape
    assert jnp.allclose(out, ref, atol=1e-4, rtol=1e-4), "mismatch vs reference"

    print("KERNEL_OK")
</pallas_src>

<mosaic_0001>
module attributes {stable_mosaic.version = 11 : i64} {
  func.func @_double_conv_kernel(%arg0: i32, %arg1: memref<24x64xf32, #tpu.memory_space<vmem>>, %arg2: memref<24x1xf32, #tpu.memory_space<vmem>>, %arg3: memref<192x128xf32, #tpu.memory_space<vmem>>, %arg4: memref<1x128xf32, #tpu.memory_space<vmem>>, %arg5: memref<384x128xf32, #tpu.memory_space<vmem>>, %arg6: memref<1x128xf32, #tpu.memory_space<vmem>>, %arg7: memref<24x128xf32, #tpu.memory_space<vmem>>) attributes {dimension_semantics = [#tpu.dimension_semantics<parallel>], iteration_bounds = array<i64: 2>, scalar_prefetch = 0 : i64, scratch_operands = 0 : i64, tpu.core_type = #tpu.core_type<tc>, window_params = [{transform_indices = @transform_0, window_bounds = array<i64: 24, 64>}, {pipeline_mode = #tpu.pipeline_mode<synchronous>, transform_indices = @transform_1, window_bounds = array<i64: 24, 1>}, {pipeline_mode = #tpu.pipeline_mode<synchronous>, transform_indices = @transform_2, window_bounds = array<i64: 192, 128>}, {pipeline_mode = #tpu.pipeline_mode<synchronous>, transform_indices = @transform_3, window_bounds = array<i64: 1, 128>}, {pipeline_mode = #tpu.pipeline_mode<synchronous>, transform_indices = @transform_4, window_bounds = array<i64: 384, 128>}, {pipeline_mode = #tpu.pipeline_mode<synchronous>, transform_indices = @transform_5, window_bounds = array<i64: 1, 128>}, {transform_indices = @transform_6, window_bounds = array<i64: 24, 128>}]} {
    %c0 = arith.constant 0 : index
    %c0_0 = arith.constant 0 : index
    %0 = vector.load %arg1[%c0, %c0_0] : memref<24x64xf32, #tpu.memory_space<vmem>>, vector<24x64xf32>
    %cst = arith.constant 0.000000e+00 : f32
    %1 = vector.broadcast %cst : f32 to vector<1x64xf32>
    %2 = vector.extract_strided_slice %0 {offsets = [0, 0], sizes = [23, 64], strides = [1, 1]} : vector<24x64xf32> to vector<23x64xf32>
    %3 = tpu.concatenate %1, %2 in 0 : vector<1x64xf32>, vector<23x64xf32> -> vector<24x64xf32>
    %4 = vector.extract_strided_slice %0 {offsets = [1, 0], sizes = [23, 64], strides = [1, 1]} : vector<24x64xf32> to vector<23x64xf32>
    %5 = tpu.concatenate %4, %1 in 0 : vector<23x64xf32>, vector<1x64xf32> -> vector<24x64xf32>
    %6 = tpu.concatenate %3, %0, %5 in 1 : vector<24x64xf32>, vector<24x64xf32>, vector<24x64xf32> -> vector<24x192xf32>
    %c0_1 = arith.constant 0 : index
    %c0_2 = arith.constant 0 : index
    %7 = vector.load %arg3[%c0_1, %c0_2] : memref<192x128xf32, #tpu.memory_space<vmem>>, vector<192x128xf32>
    %cst_3 = arith.constant dense<0.000000e+00> : vector<24x128xf32>
    %8 = tpu.matmul %6, %7, %cst_3 {dimension_numbers = #tpu.dot_dimension_numbers<[1], [0], [0], [1], [0, 0, 1, 1], [], []>} : vector<24x192xf32>, vector<192x128xf32>, vector<24x128xf32> -> vector<24x128xf32>
    %c0_4 = arith.constant 0 : index
    %c0_5 = arith.constant 0 : index
    %9 = vector.load %arg4[%c0_4, %c0_5] : memref<1x128xf32, #tpu.memory_space<vmem>>, vector<1x128xf32>
    %10 = vector.broadcast %9 : vector<1x128xf32> to vector<24x128xf32>
    %11 = arith.addf %8, %10 : vector<24x128xf32>
    %cst_6 = arith.constant 0.000000e+00 : f32
    %12 = vector.broadcast %cst_6 : f32 to vector<24x128xf32>
    %13 = arith.maximumf %11, %12 : vector<24x128xf32>
    %c0_7 = arith.constant 0 : index
    %c0_8 = arith.constant 0 : index
    %14 = vector.load %arg2[%c0_7, %c0_8] : memref<24x1xf32, #tpu.memory_space<vmem>>, vector<24x1xf32>
    %15 = vector.broadcast %14 : vector<24x1xf32> to vector<24x128xf32>
    %16 = arith.mulf %13, %15 : vector<24x128xf32>
    %cst_9 = arith.constant 0.000000e+00 : f32
    %17 = vector.broadcast %cst_9 : f32 to vector<1x128xf32>
    %18 = vector.extract_strided_slice %16 {offsets = [0, 0], sizes = [23, 128], strides = [1, 1]} : vector<24x128xf32> to vector<23x128xf32>
    %19 = tpu.concatenate %17, %18 in 0 : vector<1x128xf32>, vector<23x128xf32> -> vector<24x128xf32>
    %20 = vector.extract_strided_slice %16 {offsets = [1, 0], sizes = [23, 128], strides = [1, 1]} : vector<24x128xf32> to vector<23x128xf32>
    %21 = tpu.concatenate %20, %17 in 0 : vector<23x128xf32>, vector<1x128xf32> -> vector<24x128xf32>
    %22 = tpu.concatenate %19, %16, %21 in 1 : vector<24x128xf32>, vector<24x128xf32>, vector<24x128xf32> -> vector<24x384xf32>
    %c0_10 = arith.constant 0 : index
    %c0_11 = arith.constant 0 : index
    %23 = vector.load %arg5[%c0_10, %c0_11] : memref<384x128xf32, #tpu.memory_space<vmem>>, vector<384x128xf32>
    %cst_12 = arith.constant dense<0.000000e+00> : vector<24x128xf32>
    %24 = tpu.matmul %22, %23, %cst_12 {dimension_numbers = #tpu.dot_dimension_numbers<[1], [0], [0], [1], [0, 0, 1, 1], [], []>} : vector<24x384xf32>, vector<384x128xf32>, vector<24x128xf32> -> vector<24x128xf32>
    %c0_13 = arith.constant 0 : index
    %c0_14 = arith.constant 0 : index
    %25 = vector.load %arg6[%c0_13, %c0_14] : memref<1x128xf32, #tpu.memory_space<vmem>>, vector<1x128xf32>
    %26 = vector.broadcast %25 : vector<1x128xf32> to vector<24x128xf32>
    %27 = arith.addf %24, %26 : vector<24x128xf32>
    %cst_15 = arith.constant 0.000000e+00 : f32
    %28 = vector.broadcast %cst_15 : f32 to vector<24x128xf32>
    %29 = arith.maximumf %27, %28 : vector<24x128xf32>
    %c0_16 = arith.constant 0 : index
    %c0_17 = arith.constant 0 : index
    %30 = vector.load %arg7[%c0_16, %c0_17] : memref<24x128xf32, #tpu.memory_space<vmem>>, vector<24x128xf32>
    tpu.vector_store %arg7[%c0_16, %c0_17], %29 {strides = array<i32>} : memref<24x128xf32, #tpu.memory_space<vmem>>, vector<24x128xf32>,
    return
  }
  func.func @transform_0(%arg0: i32) -> (i32, i32) {
    %c0_i32 = arith.constant 0 : i32
    %c0_i32_0 = arith.constant 0 : i32
    return %arg0, %c0_i32 : i32, i32
  }
  func.func @transform_1(%arg0: i32) -> (i32, i32) {
    %c0_i32 = arith.constant 0 : i32
    %c0_i32_0 = arith.constant 0 : i32
    %c0_i32_1 = arith.constant 0 : i32
    return %c0_i32, %c0_i32_0 : i32, i32
  }
  func.func @transform_2(%arg0: i32) -> (i32, i32) {
    %c0_i32 = arith.constant 0 : i32
    %c0_i32_0 = arith.constant 0 : i32
    %c0_i32_1 = arith.constant 0 : i32
    return %c0_i32, %c0_i32_0 : i32, i32
  }
  func.func @transform_3(%arg0: i32) -> (i32, i32) {
    %c0_i32 = arith.constant 0 : i32
    %c0_i32_0 = arith.constant 0 : i32
    %c0_i32_1 = arith.constant 0 : i32
    return %c0_i32, %c0_i32_0 : i32, i32
  }
  func.func @transform_4(%arg0: i32) -> (i32, i32) {
    %c0_i32 = arith.constant 0 : i32
    %c0_i32_0 = arith.constant 0 : i32
    %c0_i32_1 = arith.constant 0 : i32
    return %c0_i32, %c0_i32_0 : i32, i32
  }
  func.func @transform_5(%arg0: i32) -> (i32, i32) {
    %c0_i32 = arith.constant 0 : i32
    %c0_i32_0 = arith.constant 0 : i32
    %c0_i32_1 = arith.constant 0 : i32
    return %c0_i32, %c0_i32_0 : i32, i32
  }
  func.func @transform_6(%arg0: i32) -> (i32, i32) {
    %c0_i32 = arith.constant 0 : i32
    %c0_i32_0 = arith.constant 0 : i32
    return %arg0, %c0_i32 : i32, i32
  }
}

</mosaic_0001>

<bundles_post_ra>
// kernel: tile.13
= control target key start
LH: loop header
LB: loop body
LE: loop exit
PB: predicated region body
PF: predicated region fallthrough
CT: control target
= control target key end

     0   :  { %s28_s0 = inlined_call_operand.vmem [shape: f32[8], index: 0, kind: input, shape index: {}]   ;;  %s29_s1 = inlined_call_operand.vmem [shape: f32[16,8], index: 1, kind: output, shape index: {}]  }
   0x1   :  { %v4_v0 = vld [vmem:[%s28_s0] ss:$0 sm:$0xff] }
   0x2   :  { %5 = vst [vmem:[%s29_s1] sm:$0xff] %v4_v0 }
   0x3   :  { %8 = vst [vmem:[%s29_s1 + $0x8] sm:$0xff] %v4_v0 }

// kernel: tile.14
= control target key start
LH: loop header
LB: loop body
LE: loop exit
PB: predicated region body
PF: predicated region fallthrough
CT: control target
= control target key end

     0   :  { %s131_s10 = smov 120   ;;  %s132_s11 = smov 104   ;;  %vm3_vm0 = vcmask 64512   ;;  %vm9_vm1 = vcmask 1048512   ;;  %vm15_vm2 = vcmask 982912   ;;  %vm21_vm3 = vcmask 917312   ;;  %s207_s0 = inlined_call_operand.vmem [shape: f32[16,8], index: 0, kind: input, shape index: {}]   ;;  %s208_s1 = inlined_call_operand.vmem [shape: f32[1,128], index: 1, kind: output, shape index: {}]  }
   0x1   :  { %v101_v0 = vld [vmem:[%s207_s0 + $0xf] sm:$0x1]   ;;  %v103_v1 = vld [vmem:[%s207_s0 + $0xd] sm:$0x1]   ;;  %v105_v2 = vld [vmem:[%s207_s0 + $0xb] sm:$0x1]  }
   0x2   :  { %7 = vrot.lane.b32.xlu0 %v101_v0, %s131_s10  ;;  %19 = vrot.lane.b32.xlu1 %v103_v1, %s132_s11  ;;  %s133_s14 = smov 88   ;;  %v102_v3 = vld [vmem:[%s207_s0 + $0xe] sm:$0x1]   ;;  %v104_v4 = vld [vmem:[%s207_s0 + $0xc] sm:$0x1]   ;;  %s134_s19 = smov 112  }
   0x3   :  { %31 = vrot.lane.b32.xlu2 %v105_v2, %s133_s14  ;;  %s135_s20 = smov 96   ;;  %v106_v5 = vld [vmem:[%s207_s0 + $0xa] sm:$0x1]   ;;  %s136_s23 = smov 80   ;;  %v107_v6 = vld [vmem:[%s207_s0 + $0x9] sm:$0x1]  }
   0x4   :  { %v108_v7 = vld [vmem:[%s207_s0 + $0x8] sm:$0x1]   ;;  %s137_s28 = smov 72   ;;  %s138_s29 = smov 64   ;;  %v109_v8 = vld [vmem:[%s207_s0 + $0x7] sm:$0x1]  }
   0x5   :  { %s139_s3 = smov 56   ;;  %v110_v9 = vld [vmem:[%s207_s0 + $0x6] sm:$0x1]   ;;  %v111_v10 = vld [vmem:[%s207_s0 + $0x5] sm:$0x1]   ;;  %s140_s8 = smov 48  }
   0x6   :  { %s141_s9 = smov 40   ;;  %v112_v11 = vld [vmem:[%s207_s0 + $0x4] sm:$0x1]   ;;  %s142_s12 = smov 32   ;;  %v113_v12 = vld [vmem:[%s207_s0 + $0x3] sm:$0x1]  }
   0x7   :  { %v114_v13 = vld [vmem:[%s207_s0 + $0x2] sm:$0x1]   ;;  %s143_s17 = smov 24   ;;  %s144_s18 = smov 16   ;;  %v115_v14 = vld [vmem:[%s207_s0 + $0x1] sm:$0x1]  }
   0x8   :  { %s145_s21 = smov 8   ;;  %v2_v15 = vld [vmem:[%s207_s0] sm:$0x1]   ;;  %vm27_vm4 = vcmask 851712   ;;  %vm33_vm5 = vcmask 786112   ;;  %vm39_vm6 = vcmask 720512  }
   0x9   :  { %4 = vst.msk [vmem:[#allocation0] sm:$0x1] %vm3_vm0, %v2_v15   ;;  %vm45_vm7 = vcmask 654912   ;;  %vm51_vm8 = vcmask 589312   ;;  %vm57_vm9 = vcmask 523712   ;;  %vm63_vm10 = vcmask 458112  }
   0xa   :  { %13 = vrot.lane.b32.xlu0 %v102_v3, %s134_s19  ;;  %25 = vrot.lane.b32.xlu1 %v104_v4, %s135_s20  ;;  %vm69_vm11 = vcmask 392512   ;;  %vm75_vm12 = vcmask 326912   ;;  %vm81_vm13 = vcmask 261312   ;;  %vm87_vm14 = vcmask 195712  }
   0xb   :  { %37 = vrot.lane.b32.xlu2 %v106_v5, %s136_s23  ;;  %vm93_vm15 = vcmask 130112  }
  0x12   :  { %43 = vrot.lane.b32.xlu0 %v107_v6, %s137_s28  ;;  %49 = vrot.lane.b32.xlu1 %v108_v7, %s138_s29 }
  0x13   :  { %55 = vrot.lane.b32.xlu2 %v109_v8, %s139_s3 }
  0x1a   :  { %61 = vrot.lane.b32.xlu0 %v110_v9, %s140_s8  ;;  %67 = vrot.lane.b32.xlu1 %v111_v10, %s141_s9 }
  0x1b   :  { %73 = vrot.lane.b32.xlu2 %v112_v11, %s142_s12 }
  0x22   :  { %79 = vrot.lane.b32.xlu0 %v113_v12, %s143_s17  ;;  %85 = vrot.lane.b32.xlu1 %v114_v13, %s144_s18 }
  0x23   :  { %91 = vrot.lane.b32.xlu2 %v115_v14, %s145_s21 }
  0x5d   :  { %v32_v16 = vpop.permute.xlu2 %31  }
  0x65   :  { %v38_v17 = vpop.permute.xlu2 %37  }
  0x6d   :  { %v56_v18 = vpop.permute.xlu2 %55  }
  0x74   :  { %v8_v19 = vpop.permute.xlu0 %7   ;;  %v20_v20 = vpop.permute.xlu1 %19  }
  0x75   :  { %10 = vst.msk [vmem:[#allocation0] sm:$0x1] %vm9_vm1, %v8_v19   ;;  %v74_v21 = vpop.permute.xlu2 %73  }
  0x7c   :  { %v14_v22 = vpop.permute.xlu0 %13   ;;  %v26_v23 = vpop.permute.xlu1 %25  }
  0x7d   :  { %16 = vst.msk [vmem:[#allocation0] sm:$0x1] %vm15_vm2, %v14_v22   ;;  %v92_v24 = vpop.permute.xlu2 %91  }
  0x7e   :  { %22 = vst.msk [vmem:[#allocation0] sm:$0x1] %vm21_vm3, %v20_v20  }
  0x7f   :  { %28 = vst.msk [vmem:[#allocation0] sm:$0x1] %vm27_vm4, %v26_v23  }
  0x80   :  { %34 = vst.msk [vmem:[#allocation0] sm:$0x1] %vm33_vm5, %v32_v16  }
  0x81   :  { %40 = vst.msk [vmem:[#allocation0] sm:$0x1] %vm39_vm6, %v38_v17  }
  0x84   :  { %v44_v25 = vpop.permute.xlu0 %43   ;;  %v50_v26 = vpop.permute.xlu1 %49  }
  0x85   :  { %46 = vst.msk [vmem:[#allocation0] sm:$0x1] %vm45_vm7, %v44_v25  }
  0x86   :  { %52 = vst.msk [vmem:[#allocation0] sm:$0x1] %vm51_vm8, %v50_v26  }
  0x87   :  { %58 = vst.msk [vmem:[#allocation0] sm:$0x1] %vm57_vm9, %v56_v18  }
  0x8c   :  { %v62_v27 = vpop.permute.xlu0 %61   ;;  %v68_v28 = vpop.permute.xlu1 %67  }
  0x8d   :  { %64 = vst.msk [vmem:[#allocation0] sm:$0x1] %vm63_vm10, %v62_v27  }
  0x8e   :  { %70 = vst.msk [vmem:[#allocation0] sm:$0x1] %vm69_vm11, %v68_v28  }
  0x8f   :  { %76 = vst.msk [vmem:[#allocation0] sm:$0x1] %vm75_vm12, %v74_v21  }
  0x94   :  { %v80_v29 = vpop.permute.xlu0 %79   ;;  %v86_v30 = vpop.permute.xlu1 %85  }
  0x95   :  { %82 = vst.msk [vmem:[#allocation0] sm:$0x1] %vm81_vm13, %v80_v29  }
  0x96   :  { %88 = vst.msk [vmem:[#allocation0] sm:$0x1] %vm87_vm14, %v86_v30  }
  0x97   :  { %94 = vst.msk [vmem:[#allocation0] sm:$0x1] %vm93_vm15, %v92_v24  }
  0x9e   :  { %v97_v31 = vld [vmem:[#allocation0] sm:$0x1] }
  0x9f   :  { %100 = vst [vmem:[%s208_s1] sm:$0x1] %v97_v31 }

// kernel: double_conv.1
= control target key start
LH: loop header
LB: loop body
LE: loop exit
PB: predicated region body
PF: predicated region fallthrough
CT: control target
= control target key end

     0   :  { %s691_s21 = smov 0   ;;  %s975_s0 = inlined_call_operand.vmem [shape: f32[48,64], index: 0, kind: input, shape index: {}]   ;;  %s976_s1 = inlined_call_operand.vmem [shape: f32[24,1], index: 1, kind: input, shape index: {}]   ;;  %s977_s2 = inlined_call_operand.vmem [shape: f32[192,128], index: 2, kind: input, shape index: {}]   ;;  %s978_s3 = inlined_call_operand.vmem [shape: f32[1,128], index: 3, kind: input, shape index: {}]   ;;  %s979_s4 = inlined_call_operand.vmem [shape: f32[384,128], index: 4, kind: input, shape index: {}]   ;;  %s980_s5 = inlined_call_operand.vmem [shape: f32[1,128], index: 5, kind: input, shape index: {}]   ;;  %s981_s6 = inlined_call_operand.vmem [shape: f32[48,128], index: 6, kind: output, shape index: {}]  }
   0x1 LB: > { %s616_s22 = sadd.s32 4294967295, %s652_s21   ;;  %p620_p0 = scmp.ge.s32.totalorder %s652_s21, 1  ;;  %s652_s21 = sphi %s691_s21, %s16_s21  }
   0x2   : > { %p213_p1 = scmp.lt.s32.totalorder %s652_s21, 3 }
   0x4   : > { %p214_p2 = pnand %p620_p0, %p213_p1 }
   0x5   : > { %s243_s23 = smul.u32 (!%p214_p2), 3, %s616_s22  ;;  %s654_s24 = smov (!%p214_p2), 64  }
   0x6   : > { %217 = sbr.rel (%p214_p2) target bundleno = 425 (0x1a9), region = 44 }
   0x7   : > { %p244_p3 = scmp.lt.s32.totalorder (!%p214_p2), %s243_s23, 5 }
   0xb   : > { %v307_v0 = vld [vmem:[%s977_s2 + $0x78] sm:$0xff]  ;;  %v306_v1 = vld [vmem:[%s977_s2 + $0x70] sm:$0xff]  ;;  %v305_v2 = vld [vmem:[%s977_s2 + $0x68] sm:$0xff]  ;;  %s983_s23 = smov (!%p244_p3, %s243_s23), 5  ;;  %vm271_vm0 = vcmask 1046528   ;;  %vm288_vm1 = vcmask 523264  }
   0xc   : > { %327 = vmatpush.msra.mxu0 %v307_v0  ;;  %v315_v3 = vld [vmem:[%s977_s2 + $0xb8] sm:$0xff]  ;;  %v304_v4 = vld [vmem:[%s977_s2 + $0x60] sm:$0xff]  ;;  %v314_v5 = vld [vmem:[%s977_s2 + $0xb0] sm:$0xff]  ;;  %s621_s14 = sshll.u32 %s983_s23, 3  ;;  %vm261_vm2 = vcmask 1040384   ;;  %v655_v37 = vmov 0  }
   0xd   : > { %361 = vmatpush.msra.mxu1 %v315_v3  ;;  %v313_v6 = vld [vmem:[%s977_s2 + $0xa8] sm:$0xff]  ;;  %v303_v7 = vld [vmem:[%s977_s2 + $0x58] sm:$0xff]  ;;  %s247_s19 = scalar_lea.vmem %s975_s0, %s621_s14  ;;  %v312_v8 = vld [vmem:[%s977_s2 + $0xa0] sm:$0xff]  ;;  %641 = vset.pattern.permute.xlu1 %v655_v37  ;;  %s253_s13 = scalar_lea.vmem %s981_s6, %s621_s14 }
   0xe   : > { %328 = vmatpush.msra.mxu0 %v306_v1  ;;  %v734_v9 = vld [vmem:[%s247_s19] sm:$0xff]  ;;  %v257_v10 = vld [vmem:[%s247_s19 + $0x10] sm:$0xff]  ;;  %v311_v12 = vld [vmem:[%s977_s2 + $0x98] sm:$0xff]  ;;  %642 = vset.pattern.permute.xlu2 %v655_v37 }
   0xf   : > { %362 = vmatpush.msra.mxu1 %v314_v5  ;;  %279 = vrot.lane.b32.xlu0 %v734_v9, %s654_s24  ;;  %v302_v11 = vld [vmem:[%s977_s2 + $0x50] sm:$0xff]  ;;  %v301_v13 = vld [vmem:[%s977_s2 + $0x48] sm:$0xff]  ;;  %v300_v15 = vld [vmem:[%s977_s2 + $0x40] sm:$0xff]  ;;  %v272_v24 = vrot.slane %v734_v9, 1  ;;  %v262_v31 = vrot.slane %v734_v9, 7  ;;  %v265_v32 = vrot.slane %v257_v10, 7 }
  0x10   : > { %329 = vmatpush.msra.mxu0 %v305_v2  ;;  %283 = vrot.lane.b32.xlu1 %v257_v10, %s654_s24  ;;  %v310_v14 = vld [vmem:[%s977_s2 + $0x90] sm:$0xff]  ;;  %v256_v16 = vld [vmem:[%s247_s19 + $0x8] sm:$0xff]  ;;  %v299_v17 = vld [vmem:[%s977_s2 + $0x38] sm:$0xff]  ;;  %v275_v33 = vrot.slane %v257_v10, 1 }
  0x11   : > { %363 = vmatpush.msra.mxu1 %v313_v6  ;;  %v298_v18 = vld [vmem:[%s977_s2 + $0x30] sm:$0xff]  ;;  %v297_v19 = vld [vmem:[%s977_s2 + $0x28] sm:$0xff]  ;;  %v296_v20 = vld [vmem:[%s977_s2 + $0x20] sm:$0xff]  ;;  %v273_v25 = vrot.slane %v256_v16, 1  ;;  %v263_v30 = vrot.slane %v256_v16, 7  ;;  %643 = vset.pattern.permute.xlu0 %v655_v37  ;;  %v270_v60 = vsel %vm261_vm2, 0.0, %v262_v31 }
  0x12   : > { %330 = vmatpush.msra.mxu0 %v304_v4  ;;  %v295_v21 = vld [vmem:[%s977_s2 + $0x18] sm:$0xff]  ;;  %v294_v22 = vld [vmem:[%s977_s2 + $0x10] sm:$0xff]  ;;  %v293_v23 = vld [vmem:[%s977_s2 + $0x8] sm:$0xff]  ;;  %v278_v39 = vsel %vm271_vm0, %v275_v33, 0.0 }
  0x13   : > { %364 = vmatpush.msra.mxu1 %v312_v8  ;;  %v292_v26 = vld [vmem:[%s977_s2] sm:$0xff]  ;;  %v309_v27 = vld [vmem:[%s977_s2 + $0x88] sm:$0xff]  ;;  %v274_v29 = vsel %vm271_vm0, %v272_v24, %v273_v25  ;;  %v787_v34 = vsel %vm261_vm2, %v262_v31, %v263_v30  ;;  %v276_v35 = vsel %vm271_vm0, %v273_v25, %v275_v33  ;;  %v791_v36 = vsel %vm261_vm2, %v263_v30, %v265_v32  ;;  %v455_v41 = vld [vmem:[%s979_s4 + $0xf8] sm:$0xff] }
  0x14   : > { %331 = vmatpush.msra.mxu0 %v303_v7  ;;  %v308_v28 = vld [vmem:[%s977_s2 + $0x80] sm:$0xff]  ;;  %v383_v40 = vld [vmem:[%s976_s1 + $0x8] sm:$0xff]  ;;  %v439_v42 = vld [vmem:[%s979_s4 + $0x78] sm:$0xff]  ;;  %502 = vmatpush.msra.mxu3 %v455_v41 }
  0x15   : > { %365 = vmatpush.msra.mxu1 %v311_v12  ;;  %v382_v38 = vld [vmem:[%s976_s1] sm:$0xff]  ;;  %392 = vperm.xlu2 %642, %v383_v40   ;;  %v454_v43 = vld [vmem:[%s979_s4 + $0xf0] sm:$0xff]  ;;  %v453_v45 = vld [vmem:[%s979_s4 + $0xe8] sm:$0xff] }
  0x16   : > { %332 = vmatpush.msra.mxu0 %v302_v11  ;;  %v438_v44 = vld [vmem:[%s979_s4 + $0x70] sm:$0xff]  ;;  %476 = vmatpush.msra.mxu2 %v439_v42  ;;  %v437_v46 = vld [vmem:[%s979_s4 + $0x68] sm:$0xff]  ;;  %v471_v47 = vld [vmem:[%s979_s4 + $0x178] sm:$0xff] }
  0x17   : > { %366 = vmatpush.msra.mxu1 %v310_v14  ;;  %281 = vrot.lane.b32.xlu0 %v256_v16, %s654_s24  ;;  %v452_v48 = vld [vmem:[%s979_s4 + $0xe0] sm:$0xff]  ;;  %v470_v49 = vld [vmem:[%s979_s4 + $0x170] sm:$0xff]  ;;  %v451_v52 = vld [vmem:[%s979_s4 + $0xd8] sm:$0xff] }
  0x18   : > { %333 = vmatpush.msra.mxu0 %v301_v13  ;;  %387 = vperm.xlu1 %641, %v382_v38   ;;  %v384_v50 = vld [vmem:[%s976_s1 + $0x10] sm:$0xff]  ;;  %v436_v51 = vld [vmem:[%s979_s4 + $0x60] sm:$0xff]  ;;  %v469_v53 = vld [vmem:[%s979_s4 + $0x168] sm:$0xff] }
  0x19   : > { %367 = vmatpush.msra.mxu1 %v309_v27  ;;  %503 = vmatpush.msra.mxu3 %v454_v43  ;;  %v435_v54 = vld [vmem:[%s979_s4 + $0x58] sm:$0xff]  ;;  %v450_v55 = vld [vmem:[%s979_s4 + $0xd0] sm:$0xff]  ;;  %v468_v56 = vld [vmem:[%s979_s4 + $0x160] sm:$0xff] }
  0x1a   : > { %334 = vmatpush.msra.mxu0 %v300_v15  ;;  %477 = vmatpush.msra.mxu2 %v438_v44  ;;  %v434_v57 = vld [vmem:[%s979_s4 + $0x50] sm:$0xff]  ;;  %v449_v58 = vld [vmem:[%s979_s4 + $0xc8] sm:$0xff]  ;;  %v467_v59 = vld [vmem:[%s979_s4 + $0x158] sm:$0xff] }
  0x1b   : > { %368 = vmatpush.msra.mxu1 %v308_v28  ;;  %504 = vmatpush.msra.mxu3 %v453_v45  ;;  %v433_v61 = vld [vmem:[%s979_s4 + $0x48] sm:$0xff]  ;;  %v448_v62 = vld [vmem:[%s979_s4 + $0xc0] sm:$0xff]  ;;  %v466_v1 = vld [vmem:[%s979_s4 + $0x150] sm:$0xff] }
  0x1c   : > { %335 = vmatpush.msra.mxu0 %v299_v17  ;;  %623 = vmatmul.msk.f32.vlgmr.msra.gmra.mxu1 %vm288_vm1, %v274_v29  ;;  %v432_v0 = vld [vmem:[%s979_s4 + $0x40] sm:$0xff]  ;;  %v447_v3 = vld [vmem:[%s979_s4 + $0xb8] sm:$0xff]  ;;  %v446_v5 = vld [vmem:[%s979_s4 + $0xb0] sm:$0xff] }
  0x1d   : > { %528 = vmatpush.msrb.mxu1 %v471_v47  ;;  %478 = vmatpush.msra.mxu2 %v437_v46  ;;  %v431_v4 = vld [vmem:[%s979_s4 + $0x38] sm:$0xff]  ;;  %v430_v6 = vld [vmem:[%s979_s4 + $0x30] sm:$0xff]  ;;  %v445_v7 = vld [vmem:[%s979_s4 + $0xa8] sm:$0xff] }
  0x1e   : > { %336 = vmatpush.msra.mxu0 %v298_v18  ;;  %505 = vmatpush.msra.mxu3 %v452_v48  ;;  %v429_v12 = vld [vmem:[%s979_s4 + $0x28] sm:$0xff]  ;;  %v444_v13 = vld [vmem:[%s979_s4 + $0xa0] sm:$0xff]  ;;  %v443_v16 = vld [vmem:[%s979_s4 + $0x98] sm:$0xff] }
  0x1f   : > { %529 = vmatpush.msrb.mxu1 %v470_v49  ;;  %397 = vperm.xlu2 %642, %v384_v50   ;;  %v465_v14 = vld [vmem:[%s979_s4 + $0x148] sm:$0xff]  ;;  %v428_v15 = vld [vmem:[%s979_s4 + $0x20] sm:$0xff]  ;;  %v427_v18 = vld [vmem:[%s979_s4 + $0x18] sm:$0xff] }
  0x20   : > { %337 = vmatpush.msra.mxu0 %v297_v19  ;;  %479 = vmatpush.msra.mxu2 %v436_v51  ;;  %v464_v17 = vld [vmem:[%s979_s4 + $0x140] sm:$0xff]  ;;  %v442_v19 = vld [vmem:[%s979_s4 + $0x90] sm:$0xff]  ;;  %v425_v24 = vld [vmem:[%s979_s4 + $0x8] sm:$0xff] }
  0x21   : > { %506 = vmatpush.msra.mxu3 %v451_v52  ;;  %530 = vmatpush.msrb.mxu1 %v469_v53  ;;  %v440_v25 = vld [vmem:[%s979_s4 + $0x80] sm:$0xff]  ;;  %v459_v29 = vld [vmem:[%s979_s4 + $0x118] sm:$0xff]  ;;  %v458_v30 = vld [vmem:[%s979_s4 + $0x110] sm:$0xff] }
  0x22   : > { %338 = vmatpush.msra.mxu0 %v296_v20  ;;  %480 = vmatpush.msra.mxu2 %v435_v54  ;;  %v463_v20 = vld [vmem:[%s979_s4 + $0x138] sm:$0xff]  ;;  %v424_v27 = vld [vmem:[%s979_s4] sm:$0xff]  ;;  %v457_v31 = vld [vmem:[%s979_s4 + $0x108] sm:$0xff] }
  0x23   : > { %507 = vmatpush.msra.mxu3 %v450_v55  ;;  %531 = vmatpush.msrb.mxu1 %v468_v56  ;;  %v460_v28 = vld [vmem:[%s979_s4 + $0x120] sm:$0xff]  ;;  %vm626_vm3 = vmneg %vm261_vm2 }
  0x24   : > { %339 = vmatpush.msra.mxu0 %v295_v21  ;;  %624 = vmatmul.msk.f32.gmra.mxu1 %vm288_vm1, %v276_v35  ;;  %v426_v21 = vld [vmem:[%s979_s4 + $0x10] sm:$0xff]  ;;  %v456_v32 = vld [vmem:[%s979_s4 + $0x100] sm:$0xff] }
  0x25   : > { %481 = vmatpush.msra.mxu2 %v434_v57  ;;  %508 = vmatpush.msra.mxu3 %v449_v58 }
  0x26   : > { %340 = vmatpush.msra.mxu0 %v294_v22  ;;  %532 = vmatpush.msrb.mxu1 %v467_v59  ;;  %v441_v22 = vld [vmem:[%s979_s4 + $0x88] sm:$0xff] }
  0x27   : > { %482 = vmatpush.msra.mxu2 %v433_v61  ;;  %509 = vmatpush.msra.mxu3 %v448_v62 }
  0x28   : > { %341 = vmatpush.msra.mxu0 %v293_v23  ;;  %533 = vmatpush.msrb.mxu1 %v466_v1  ;;  %v462_v23 = vld [vmem:[%s979_s4 + $0x130] sm:$0xff]  ;;  %v645_v1 = vld [vmem:[%s980_s5] ss:$0 sm:$0xff] }
  0x29   : > { %483 = vmatpush.msra.mxu2 %v432_v0  ;;  %510 = vmatpush.msra.mxu3 %v447_v3 }
  0x2a   : > { %342 = vmatpush.msra.mxu0 %v292_v26  ;;  %534 = vmatpush.msrb.mxu1 %v465_v14  ;;  %v461_v26 = vld [vmem:[%s979_s4 + $0x128] sm:$0xff] }
  0x2b   : > { %484 = vmatpush.msra.mxu2 %v431_v4  ;;  %511 = vmatpush.msra.mxu3 %v446_v5 }
  0x2c   : > { %625 = vmatmul.msk.f32.gmra.mxu1 %vm288_vm1, %v278_v39 }
  0x2d   : > { %485 = vmatpush.msra.mxu2 %v430_v6  ;;  %512 = vmatpush.msra.mxu3 %v445_v7 }
  0x2e   : > { %535 = vmatpush.msrb.mxu1 %v464_v17 }
  0x2f   : > { %486 = vmatpush.msra.mxu2 %v429_v12  ;;  %513 = vmatpush.msra.mxu3 %v444_v13 }
  0x30   : > { %536 = vmatpush.msrb.mxu1 %v463_v20 }
  0x31   : > { %487 = vmatpush.msra.mxu2 %v428_v15  ;;  %514 = vmatpush.msra.mxu3 %v443_v16 }
  0x32   : > { %537 = vmatpush.msrb.mxu1 %v462_v23 }
  0x33   : > { %488 = vmatpush.msra.mxu2 %v427_v18  ;;  %515 = vmatpush.msra.mxu3 %v442_v19 }
  0x34   : > { %538 = vmatpush.msrb.mxu1 %v461_v26 }
  0x35   : > { %489 = vmatpush.msra.mxu2 %v426_v21  ;;  %516 = vmatpush.msra.mxu3 %v441_v22 }
  0x36   : > { %539 = vmatpush.msrb.mxu1 %v460_v28 }
  0x37   : > { %490 = vmatpush.msra.mxu2 %v425_v24  ;;  %517 = vmatpush.msra.mxu3 %v440_v25 }
  0x38   : > { %540 = vmatpush.msrb.mxu1 %v459_v29 }
  0x39   : > { %491 = vmatpush.msra.mxu2 %v424_v27 }
  0x3a   : > { %541 = vmatpush.msrb.mxu1 %v458_v30 }
  0x3c   : > { %542 = vmatpush.msrb.mxu1 %v457_v31 }
  0x3e   : > { %543 = vmatpush.msrb.mxu1 %v456_v32 }
  0x6f   : > { %v393_v46 = vpop.permute.xlu2 %392 }
  0x79   : > { %v398_v59 = vpop.permute.xlu2 %397 }
  0x81   : > { %v280_v63 = vpop.permute.xlu0 %279 }
  0x82   : > { %v289_v2 = vsel %vm288_vm1, %v270_v60, %v280_v63  ;;  %v284_v10 = vpop.permute.xlu1 %283 }
  0x83   : > { %343 = vmatmul.f32.vlgmr.msra.gmra.mxu0 %v289_v2  ;;  %v291_v11 = vsel %vm288_vm1, %v791_v36, %v284_v10 }
  0x89   : > { %v282_v8 = vpop.permute.xlu0 %281 }
  0x8a   : > { %v290_v9 = vsel %vm288_vm1, %v787_v34, %v282_v8  ;;  %v644_v34 = vld [vmem:[%s978_s3] ss:$0 sm:$0xff]  ;;  %v388_v38 = vpop.permute.xlu1 %387 }
  0x8b   : > { %346 = vmatmul.f32.gmra.mxu0 %v290_v9 }
  0x93   : > { %349 = vmatmul.f32.gmra.mxu0 %v291_v11 }
  0x99   : > { %v370_v33 = vpop.f32.mrf.mxu1 }
  0xa1   : > { %v373_v40 = vpop.f32.mrf.mxu1 }
  0xa9   : > { %v376_v50 = vpop.f32.mrf.mxu1 }
 0x100   : > { %v344_v35 = vpop.f32.mrf.mxu0 }
 0x101   : > { %v345_v36 = vadd.f32 %v644_v34, %v344_v35 }
 0x103   : > { %v371_v37 = vadd.f32 %v370_v33, %v345_v36 }
 0x105   : > { %v379_v39 = vmax.f32 %v371_v37, 0.0 }
 0x107   : > { %v400_v41 = vmul.f32 %v388_v38, %v379_v39 }
 0x108   : > { %v347_v42 = vpop.f32.mrf.mxu0 }
 0x109   : > { %v348_v43 = vadd.f32 %v644_v34, %v347_v42  ;;  %518 = vmatmul.f32.vlgmr.msra.gmra.mxu3 %v400_v41  ;;  %v406_v44 = vrot.slane %v400_v41, 7  ;;  %v415_v51 = vrot.slane %v400_v41, 1 }
 0x10b   : > { %v374_v45 = vadd.f32 %v373_v40, %v348_v43  ;;  %627 = vmatmul.msk.f32.vlgmr.msra.gmra.mxu2 %vm626_vm3, %v406_v44 }
 0x10d   : > { %v380_v47 = vmax.f32 %v374_v45, 0.0 }
 0x10f   : > { %v401_v48 = vmul.f32 %v393_v46, %v380_v47 }
 0x110   : > { %v350_v49 = vpop.f32.mrf.mxu0 }
 0x111   : > { %v351_v52 = vadd.f32 %v644_v34, %v350_v49  ;;  %521 = vmatmul.f32.gmra.mxu3 %v401_v48  ;;  %v407_v53 = vrot.slane %v401_v48, 7  ;;  %v416_v54 = vrot.slane %v401_v48, 1 }
 0x113   : > { %v377_v55 = vadd.f32 %v376_v50, %v351_v52  ;;  %v408_v56 = vsel %vm261_vm2, %v406_v44, %v407_v53  ;;  %v417_v57 = vsel %vm271_vm0, %v415_v51, %v416_v54 }
 0x114   : > { %495 = vmatmul.f32.gmra.mxu2 %v408_v56  ;;  %544 = vmatmul.f32.vlgmr.msrb.gmra.mxu1 %v417_v57 }
 0x115   : > { %v381_v58 = vmax.f32 %v377_v55, 0.0 }
 0x117   : > { %v402_v60 = vmul.f32 %v398_v59, %v381_v58 }
 0x119   : > { %524 = vmatmul.f32.gmra.mxu3 %v402_v60  ;;  %v409_v61 = vrot.slane %v402_v60, 7  ;;  %v418_v62 = vrot.slane %v402_v60, 1 }
 0x11b   : > { %v410_v63 = vsel %vm261_vm2, %v407_v53, %v409_v61  ;;  %v419_v0 = vsel %vm271_vm0, %v416_v54, %v418_v62 }
 0x11c   : > { %498 = vmatmul.f32.gmra.mxu2 %v410_v63  ;;  %547 = vmatmul.f32.gmra.mxu1 %v419_v0 }
 0x124   : > { %628 = vmatmul.msk.f32.gmra.mxu1 %vm271_vm0, %v418_v62 }
 0x18c   : > { %v519_v2 = vpop.f32.mrf.mxu3 }
 0x18e   : > { %v493_v3 = vpop.f32.mrf.mxu2 }
 0x18f   : > { %v494_v4 = vadd.f32 %v645_v1, %v493_v3 }
 0x191   : > { %v520_v5 = vadd.f32 %v519_v2, %v494_v4  ;;  %v545_v6 = vpop.f32.mrf.mxu1 }
 0x193   : > { %v546_v7 = vadd.f32 %v545_v6, %v520_v5 }
 0x194   : > { %v522_v9 = vpop.f32.mrf.mxu3 }
 0x195   : > { %v554_v8 = vmax.f32 %v546_v7, 0.0 }
 0x197   : > { %557 = vst [vmem:[%s253_s13] sm:$0xff] %v554_v8  ;;  %v496_v10 = vpop.f32.mrf.mxu2 }
 0x198   : > { %v497_v11 = vadd.f32 %v645_v1, %v496_v10 }
 0x199   : > { %v548_v12 = vpop.f32.mrf.mxu1 }
 0x19a   : > { %v523_v13 = vadd.f32 %v522_v9, %v497_v11 }
 0x19c   : > { %v549_v14 = vadd.f32 %v548_v12, %v523_v13  ;;  %v525_v18 = vpop.f32.mrf.mxu3 }
 0x19e   : > { %v555_v15 = vmax.f32 %v549_v14, 0.0 }
 0x19f   : > { %v499_v16 = vpop.f32.mrf.mxu2 }
 0x1a0   : > { %558 = vst [vmem:[%s253_s13 + $0x8] sm:$0xff] %v555_v15  ;;  %v500_v17 = vadd.f32 %v645_v1, %v499_v16 }
 0x1a1   : > { %v551_v20 = vpop.f32.mrf.mxu1 }
 0x1a2   : > { %v526_v19 = vadd.f32 %v525_v18, %v500_v17 }
 0x1a4   : > { %v552_v21 = vadd.f32 %v551_v20, %v526_v19 }
 0x1a6   : > { %v556_v22 = vmax.f32 %v552_v21, 0.0 }
 0x1a8   : > { %559 = vst [vmem:[%s253_s13 + $0x10] sm:$0xff] %v556_v22 }
 0x1a9 PF: > { %s16_s21 = sadd.s32 1, %s652_s21  }
 0x1aa   : > { %p13_p4 = scmp.ge.s32.totalorder %s16_s21, 4  }
 0x1ac   :  { %15 = sbr.rel (!%p13_p4) target bundleno = 1 (0x1), region = 74 }

</bundles_post_ra>
